<compile_context>
chip_gen: v7x
topology: tpu7x:2x2x1
jax: 0.10.0
libtpu: 0.0.40
codegen_flags: <defaults>
</compile_context>

<pallas_src>
import jax
import jax.numpy as jnp
from jax.experimental import pallas as pl
from jax.experimental.pallas import tpu as pltpu


def rnn_kernel(x_ref, w_ih_t_ref, w_hh_t_ref, b_ref, w_fc_t_ref, b_fc_ref, out_ref,
               *, T, B):
    H = w_hh_t_ref.shape[0]

    # Hoist all weight / bias loads (loaded once, reused across the whole recurrence).
    w_ih_t = w_ih_t_ref[...]        # (I, H)  bf16, pre-transposed in wrapper
    w_hh_t = w_hh_t_ref[...]        # (H, H)  bf16, pre-transposed in wrapper
    b = b_ref[...]                  # (1, H)  f32, b_ih + b_hh pre-summed in wrapper
    w_fc_t = w_fc_t_ref[...]        # (H, O)  bf16, pre-transposed in wrapper
    b_fc = b_fc_ref[...]            # (1, O)  f32

    # Hoisted input projection: one MXU matmul for all T timesteps, bias folded in.
    x_flat = x_ref[...]             # (T*B, I) bf16
    U = jnp.dot(x_flat, w_ih_t, preferred_element_type=jnp.float32) + b   # (T*B, H) f32

    # Time recurrence: short serial chain {vmatmul + vadd + tanh} per step.
    # T is tiny & static -> static Python unroll with static slices of U.
    h = jnp.zeros((B, H), jnp.float32)
    for t in range(T):
        u_t = U[t * B:(t + 1) * B, :]                                     # (B, H) f32
        pre = u_t + jnp.dot(h.astype(jnp.bfloat16), w_hh_t,
                            preferred_element_type=jnp.float32)
        h = jnp.tanh(pre)

    # Final FC head. O=10 -> masked partial store; negligible at this size.
    # (If O grows, pad O to a multiple of 128 here and slice in the wrapper.)
    logits = jnp.dot(h.astype(jnp.bfloat16), w_fc_t,
                     preferred_element_type=jnp.float32) + b_fc
    out_ref[...] = logits.astype(out_ref.dtype)


def rnn_forward(x, w_ih, w_hh, b_ih, b_hh, w_fc, b_fc):
    """x: (T, B, I) float32. Returns logits (B, output_size), float32."""
    T, B, I = x.shape
    H = w_hh.shape[0]
    O = w_fc.shape[0]

    # Wrapper-side layout plumbing (free): flatten x, pre-transpose weights,
    # pre-sum biases, cast MXU operands to bf16.
    x_flat = x.reshape(T * B, I).astype(jnp.bfloat16)           # (T*B, I)
    w_ih_t = jnp.transpose(w_ih).astype(jnp.bfloat16)           # (I, H)
    w_hh_t = jnp.transpose(w_hh).astype(jnp.bfloat16)           # (H, H)
    w_fc_t = jnp.transpose(w_fc).astype(jnp.bfloat16)           # (H, O)
    b_sum = (b_ih + b_hh).reshape(1, H).astype(jnp.float32)     # (1, H)
    b_fc2 = b_fc.reshape(1, O).astype(jnp.float32)              # (1, O)

    vmem = pl.BlockSpec(memory_space=pltpu.MemorySpace.VMEM)

    import functools
    kernel = functools.partial(rnn_kernel, T=T, B=B)

    return pl.pallas_call(
        kernel,
        out_shape=jax.ShapeDtypeStruct((B, O), jnp.float32),
        in_specs=[vmem] * 6,
        out_specs=vmem,
    )(x_flat, w_ih_t, w_hh_t, b_sum, w_fc_t, b_fc2)


def rnn_reference(x, w_ih, w_hh, b_ih, b_hh, w_fc, b_fc):
    """Pure-JAX f32 reference matching PyTorch nn.RNN(tanh) + Linear on last hidden state."""
    T, B, _ = x.shape
    H = w_hh.shape[0]
    h = jnp.zeros((B, H), jnp.float32)
    for t in range(T):
        h = jnp.tanh(x[t] @ w_ih.T + b_ih + h @ w_hh.T + b_hh)
    return h @ w_fc.T + b_fc


if __name__ == "__main__":
    # Small shapes consistent with the module's forward:
    # seq T=8, batch B=2, input_size I=16, hidden_size H=32, output_size O=10.
    T, B, I, H, O = 8, 2, 16, 32, 10

    key = jax.random.PRNGKey(0)
    kx, k1, k2, k3, k4, k5, k6 = jax.random.split(key, 7)

    # Deterministic parameter init (PyTorch-style uniform(-1/sqrt(H), 1/sqrt(H))).
    s = 1.0 / jnp.sqrt(jnp.float32(H))
    x    = jax.random.normal(kx, (T, B, I), jnp.float32)
    w_ih = jax.random.uniform(k1, (H, I), jnp.float32, -s, s)
    w_hh = jax.random.uniform(k2, (H, H), jnp.float32, -s, s)
    b_ih = jax.random.uniform(k3, (H,),   jnp.float32, -s, s)
    b_hh = jax.random.uniform(k4, (H,),   jnp.float32, -s, s)
    w_fc = jax.random.uniform(k5, (O, H), jnp.float32, -s, s)
    b_fc = jax.random.uniform(k6, (O,),   jnp.float32, -s, s)

    out = rnn_forward(x, w_ih, w_hh, b_ih, b_hh, w_fc, b_fc)
    out = jax.block_until_ready(out)

    ref = rnn_reference(x, w_ih, w_hh, b_ih, b_hh, w_fc, b_fc)
    assert out.shape == (B, O)
    # bf16 MXU operands -> tolerance loosened from 1e-5 to ~2e-2 (relative), per review.
    assert jnp.allclose(out, ref, atol=2e-2, rtol=2e-2), "mismatch vs pure-JAX reference"

    print("KERNEL_OK")
</pallas_src>

<mosaic_0001>
module attributes {stable_mosaic.version = 11 : i64} {
  func.func @rnn_kernel(%arg0: memref<16x16xbf16, #tpu.memory_space<vmem>>, %arg1: memref<16x32xbf16, #tpu.memory_space<vmem>>, %arg2: memref<32x32xbf16, #tpu.memory_space<vmem>>, %arg3: memref<1x32xf32, #tpu.memory_space<vmem>>, %arg4: memref<32x10xbf16, #tpu.memory_space<vmem>>, %arg5: memref<1x10xf32, #tpu.memory_space<vmem>>, %arg6: memref<2x10xf32, #tpu.memory_space<vmem>>) attributes {dimension_semantics = [], scalar_prefetch = 0 : i64, scratch_operands = 0 : i64, tpu.core_type = #tpu.core_type<tc>} {
    %c0 = arith.constant 0 : index
    %c0_0 = arith.constant 0 : index
    %0 = vector.load %arg1[%c0, %c0_0] : memref<16x32xbf16, #tpu.memory_space<vmem>>, vector<16x32xbf16>
    %c0_1 = arith.constant 0 : index
    %c0_2 = arith.constant 0 : index
    %1 = vector.load %arg2[%c0_1, %c0_2] : memref<32x32xbf16, #tpu.memory_space<vmem>>, vector<32x32xbf16>
    %c0_3 = arith.constant 0 : index
    %c0_4 = arith.constant 0 : index
    %2 = vector.load %arg3[%c0_3, %c0_4] : memref<1x32xf32, #tpu.memory_space<vmem>>, vector<1x32xf32>
    %c0_5 = arith.constant 0 : index
    %c0_6 = arith.constant 0 : index
    %3 = vector.load %arg4[%c0_5, %c0_6] : memref<32x10xbf16, #tpu.memory_space<vmem>>, vector<32x10xbf16>
    %c0_7 = arith.constant 0 : index
    %c0_8 = arith.constant 0 : index
    %4 = vector.load %arg5[%c0_7, %c0_8] : memref<1x10xf32, #tpu.memory_space<vmem>>, vector<1x10xf32>
    %c0_9 = arith.constant 0 : index
    %c0_10 = arith.constant 0 : index
    %5 = vector.load %arg0[%c0_9, %c0_10] : memref<16x16xbf16, #tpu.memory_space<vmem>>, vector<16x16xbf16>
    %cst = arith.constant dense<0.000000e+00> : vector<16x32xf32>
    %6 = tpu.matmul %5, %0, %cst {dimension_numbers = #tpu.dot_dimension_numbers<[1], [0], [0], [1], [0, 0, 1, 1], [], []>} : vector<16x16xbf16>, vector<16x32xbf16>, vector<16x32xf32> -> vector<16x32xf32>
    %7 = vector.broadcast %2 : vector<1x32xf32> to vector<16x32xf32>
    %8 = arith.addf %6, %7 : vector<16x32xf32>
    %cst_11 = arith.constant 0.000000e+00 : f32
    %9 = vector.broadcast %cst_11 : f32 to vector<2x32xf32>
    %10 = vector.extract_strided_slice %8 {offsets = [0, 0], sizes = [2, 32], strides = [1, 1]} : vector<16x32xf32> to vector<2x32xf32>
    %11 = arith.truncf %9 : vector<2x32xf32> to vector<2x32xbf16>
    %cst_12 = arith.constant dense<0.000000e+00> : vector<2x32xf32>
    %12 = tpu.matmul %11, %1, %cst_12 {dimension_numbers = #tpu.dot_dimension_numbers<[1], [0], [0], [1], [0, 0, 1, 1], [], []>} : vector<2x32xbf16>, vector<32x32xbf16>, vector<2x32xf32> -> vector<2x32xf32>
    %13 = arith.addf %10, %12 : vector<2x32xf32>
    %14 = math.tanh %13 : vector<2x32xf32>
    %15 = vector.extract_strided_slice %8 {offsets = [2, 0], sizes = [2, 32], strides = [1, 1]} : vector<16x32xf32> to vector<2x32xf32>
    %16 = arith.truncf %14 : vector<2x32xf32> to vector<2x32xbf16>
    %cst_13 = arith.constant dense<0.000000e+00> : vector<2x32xf32>
    %17 = tpu.matmul %16, %1, %cst_13 {dimension_numbers = #tpu.dot_dimension_numbers<[1], [0], [0], [1], [0, 0, 1, 1], [], []>} : vector<2x32xbf16>, vector<32x32xbf16>, vector<2x32xf32> -> vector<2x32xf32>
    %18 = arith.addf %15, %17 : vector<2x32xf32>
    %19 = math.tanh %18 : vector<2x32xf32>
    %20 = vector.extract_strided_slice %8 {offsets = [4, 0], sizes = [2, 32], strides = [1, 1]} : vector<16x32xf32> to vector<2x32xf32>
    %21 = arith.truncf %19 : vector<2x32xf32> to vector<2x32xbf16>
    %cst_14 = arith.constant dense<0.000000e+00> : vector<2x32xf32>
    %22 = tpu.matmul %21, %1, %cst_14 {dimension_numbers = #tpu.dot_dimension_numbers<[1], [0], [0], [1], [0, 0, 1, 1], [], []>} : vector<2x32xbf16>, vector<32x32xbf16>, vector<2x32xf32> -> vector<2x32xf32>
    %23 = arith.addf %20, %22 : vector<2x32xf32>
    %24 = math.tanh %23 : vector<2x32xf32>
    %25 = vector.extract_strided_slice %8 {offsets = [6, 0], sizes = [2, 32], strides = [1, 1]} : vector<16x32xf32> to vector<2x32xf32>
    %26 = arith.truncf %24 : vector<2x32xf32> to vector<2x32xbf16>
    %cst_15 = arith.constant dense<0.000000e+00> : vector<2x32xf32>
    %27 = tpu.matmul %26, %1, %cst_15 {dimension_numbers = #tpu.dot_dimension_numbers<[1], [0], [0], [1], [0, 0, 1, 1], [], []>} : vector<2x32xbf16>, vector<32x32xbf16>, vector<2x32xf32> -> vector<2x32xf32>
    %28 = arith.addf %25, %27 : vector<2x32xf32>
    %29 = math.tanh %28 : vector<2x32xf32>
    %30 = vector.extract_strided_slice %8 {offsets = [8, 0], sizes = [2, 32], strides = [1, 1]} : vector<16x32xf32> to vector<2x32xf32>
    %31 = arith.truncf %29 : vector<2x32xf32> to vector<2x32xbf16>
    %cst_16 = arith.constant dense<0.000000e+00> : vector<2x32xf32>
    %32 = tpu.matmul %31, %1, %cst_16 {dimension_numbers = #tpu.dot_dimension_numbers<[1], [0], [0], [1], [0, 0, 1, 1], [], []>} : vector<2x32xbf16>, vector<32x32xbf16>, vector<2x32xf32> -> vector<2x32xf32>
    %33 = arith.addf %30, %32 : vector<2x32xf32>
    %34 = math.tanh %33 : vector<2x32xf32>
    %35 = vector.extract_strided_slice %8 {offsets = [10, 0], sizes = [2, 32], strides = [1, 1]} : vector<16x32xf32> to vector<2x32xf32>
    %36 = arith.truncf %34 : vector<2x32xf32> to vector<2x32xbf16>
    %cst_17 = arith.constant dense<0.000000e+00> : vector<2x32xf32>
    %37 = tpu.matmul %36, %1, %cst_17 {dimension_numbers = #tpu.dot_dimension_numbers<[1], [0], [0], [1], [0, 0, 1, 1], [], []>} : vector<2x32xbf16>, vector<32x32xbf16>, vector<2x32xf32> -> vector<2x32xf32>
    %38 = arith.addf %35, %37 : vector<2x32xf32>
    %39 = math.tanh %38 : vector<2x32xf32>
    %40 = vector.extract_strided_slice %8 {offsets = [12, 0], sizes = [2, 32], strides = [1, 1]} : vector<16x32xf32> to vector<2x32xf32>
    %41 = arith.truncf %39 : vector<2x32xf32> to vector<2x32xbf16>
    %cst_18 = arith.constant dense<0.000000e+00> : vector<2x32xf32>
    %42 = tpu.matmul %41, %1, %cst_18 {dimension_numbers = #tpu.dot_dimension_numbers<[1], [0], [0], [1], [0, 0, 1, 1], [], []>} : vector<2x32xbf16>, vector<32x32xbf16>, vector<2x32xf32> -> vector<2x32xf32>
    %43 = arith.addf %40, %42 : vector<2x32xf32>
    %44 = math.tanh %43 : vector<2x32xf32>
    %45 = vector.extract_strided_slice %8 {offsets = [14, 0], sizes = [2, 32], strides = [1, 1]} : vector<16x32xf32> to vector<2x32xf32>
    %46 = arith.truncf %44 : vector<2x32xf32> to vector<2x32xbf16>
    %cst_19 = arith.constant dense<0.000000e+00> : vector<2x32xf32>
    %47 = tpu.matmul %46, %1, %cst_19 {dimension_numbers = #tpu.dot_dimension_numbers<[1], [0], [0], [1], [0, 0, 1, 1], [], []>} : vector<2x32xbf16>, vector<32x32xbf16>, vector<2x32xf32> -> vector<2x32xf32>
    %48 = arith.addf %45, %47 : vector<2x32xf32>
    %49 = math.tanh %48 : vector<2x32xf32>
    %50 = arith.truncf %49 : vector<2x32xf32> to vector<2x32xbf16>
    %cst_20 = arith.constant dense<0.000000e+00> : vector<2x10xf32>
    %51 = tpu.matmul %50, %3, %cst_20 {dimension_numbers = #tpu.dot_dimension_numbers<[1], [0], [0], [1], [0, 0, 1, 1], [], []>} : vector<2x32xbf16>, vector<32x10xbf16>, vector<2x10xf32> -> vector<2x10xf32>
    %52 = vector.broadcast %4 : vector<1x10xf32> to vector<2x10xf32>
    %53 = arith.addf %51, %52 : vector<2x10xf32>
    %c0_21 = arith.constant 0 : index
    %c0_22 = arith.constant 0 : index
    %54 = vector.load %arg6[%c0_21, %c0_22] : memref<2x10xf32, #tpu.memory_space<vmem>>, vector<2x10xf32>
    tpu.vector_store %arg6[%c0_21, %c0_22], %53 {strides = array<i32>} : memref<2x10xf32, #tpu.memory_space<vmem>>, vector<2x10xf32>,
    return
  }
}

</mosaic_0001>

<bundles_post_ra>
// kernel: tpu_custom_call.1
= control target key start
LH: loop header
LB: loop body
LE: loop exit
PB: predicated region body
PF: predicated region fallthrough
CT: control target
= control target key end

     0   :  { %11 = vsyncpa [#allocation3], 0  ;;  %s965_s0 = inlined_call_operand.vmem [shape: bf16[16,16], index: 0, kind: input, shape index: {}]   ;;  %s966_s1 = inlined_call_operand.hbm [shape: bf16[16,32], index: 1, kind: input, shape index: {}]   ;;  %s967_s2 = inlined_call_operand.vmem [shape: bf16[32,32], index: 2, kind: input, shape index: {}]   ;;  %s968_s3 = inlined_call_operand.vmem [shape: f32[1,32], index: 3, kind: input, shape index: {}]   ;;  %s969_s4 = inlined_call_operand.vmem [shape: bf16[32,10], index: 4, kind: input, shape index: {}]   ;;  %s970_s5 = inlined_call_operand.vmem [shape: f32[1,10], index: 5, kind: input, shape index: {}]   ;;  %s971_s6 = inlined_call_operand.hbm [shape: f32[2,10], index: 6, kind: output, shape index: {}]  }
   0x1   :  { %12 = vsyncpa [#allocation4], 0  ;;  %s805_s21 = smov [#allocation2]   ;;  %s757_s25 = scalar_lea.hbm %s966_s1, 128 }
   0x2   :  { %s20_s22 = sshll.u32 %s805_s21, 4  ;;  %p758_p0 = scmp.ne.s32.totalorder %s966_s1, %s757_s25  ;;  %s21_s22 = int_to_ptr.vmem [resolvable:$true] %s20_s22 }
   0x3   :  { %p761_p1 = scmp.lt.u32.totalorder %s757_s25, %s966_s1 }
   0x5   :  { %p763_p2 = pnand %p761_p1, %p758_p0 }
   0x7   :  { %766 = shalt.err (!%p763_p2)
}
   0x8   :  { %s767_s30 = scalar_lea.vmem %s21_s22, 128  ;;  %p772_p4 = scmp.lt.s32.totalorder %s21_s22, %s21_s22 }
   0x9   :  { %p768_p3 = scmp.ne.s32.totalorder %s21_s22, %s767_s30  ;;  %p773_p5 = scmp.lt.s32.totalorder %s767_s30, %s767_s30 }
   0xb   :  { %p774_p6 = por %p773_p5, %p772_p4 }
   0xd   :  { %p775_p7 = pnand %p774_p6, %p768_p3 }
   0xf   :  { %778 = shalt.err (!%p775_p7)
}
  0x10   :  { %s806_s7 = smov 64   ;;  %s807_s8 = smov 4  }
  0x11   :  { %26 = dma.hbm_to_vmem [thread:$0]  %s966_s1, 128, %s21_s22, [#allocation3], %s806_s7, %s806_s7, %s807_s8  }
  0x12   :  { %801 = dma.done.wait [#allocation3], 128  }
  0x13   :  { %802 = vsyncadd [#allocation3], 4294967168  ;;  %v808_v0 = vmov 0.0   ;;  %vm809_vm0 = vmmov 0   ;;  %v735_v1 = vld [vmem:[#allocation2] sm:$0xff]   ;;  %vm70_vm1 = vcmask 130048  }
  0x14   :  { %650 = vmatprep.subr.bf16.mxu0 %v808_v0  ;;  %656 = vmatprep.subr.bf16.mxu1 %v808_v0  ;;  %v868_v2 = vld [vmem:[%s967_s2] sm:$0xff]   ;;  %v877_v4 = vld [vmem:[%s967_s2 + $0x8] sm:$0xff]   ;;  %v810_v5 = vmov 0   ;;  %vm127_vm2 = vcmask 261120   ;;  %s811_s21 = smov [#allocation5]   ;;  %vm587_vm3 = vcmask 74752  }
  0x15   :  { %652 = vmatprep.mubr.msk.bf16.mxu0 %vm809_vm0, %v808_v0  ;;  %660 = vmatprep.mubr.msk.bf16.mxu1 %vm809_vm0, %v808_v0  ;;  %v737_v3 = vld [vmem:[%s965_s0] sm:$0xff]  }
  0x16   :  { %651 = vmatpush3.bf16.msra.mxu0 %v735_v1  ;;  %657 = vmatpush3.bf16.msra.mxu1 %v868_v2  ;;  %v604_v6 = vld [vmem:[%s968_s3] ss:$0 sm:$0xff] }
  0x17   :  { %664 = vmatprep.subr.bf16.mxu0 %v808_v0  ;;  %658 = vmatprep.subr.bf16.mxu1 %v808_v0 }
  0x19   :  { %653 = vmatmul.mubr.msk.bf16.vlgmr.msra.gmra.mrb[0].mxu0 %vm70_vm1, %v737_v3 }
  0x1a   :  { %665 = vmatpush3.bf16.msra.mxu0 %v868_v2  ;;  %668 = vmatprep.mubr.msk.bf16.mxu0 %vm809_vm0, %v808_v0 }
  0x1b   :  { %659 = vmatpush3.bf16.msra.mxu1 %v877_v4  ;;  %666 = vmatprep.subr.bf16.mxu0 %v808_v0 }
  0x1c   :  { %672 = vmatprep.subr.bf16.mxu1 %v808_v0 }
  0x1e   :  { %661 = vmatmul.mubr.bf16.vlgmr.msra.gmra.mrb[0].mxu1 %v810_v5  ;;  %667 = vmatpush3.bf16.msra.mxu0 %v877_v4 }
  0x1f   :  { %673 = vmatpush3.bf16.msra.mxu1 %v868_v2  ;;  %676 = vmatprep.mubr.msk.bf16.mxu1 %vm809_vm0, %v808_v0 }
  0x20   :  { %674 = vmatprep.subr.bf16.mxu1 %v808_v0  ;;  %680 = vmatprep.subr.bf16.mxu0 %v808_v0 }
  0x23   :  { %675 = vmatpush3.bf16.msra.mxu1 %v877_v4 }
  0x24   :  { %688 = vmatprep.subr.bf16.mxu1 %v808_v0 }
  0xec   :  { %v108_v7 = vpop.f32.mrb[0].mxu0 }
  0xed   :  { %v654_v8 = vpop.f32.mrb[1].mxu0  ;;  %v109_v9 = vadd.f32 %v604_v6, %v108_v7 }
  0xee   :  { %v111_v10 = vpop.f32.mrb[2].mxu0 }
  0xef   :  { %v898_v11 = vadd.f32 %v604_v6, %v111_v10  ;;  %v655_v12 = vpop.f32.mrb[3].mxu0  ;;  %v740_v10 = vld [vmem:[%s969_s4 + $0x8] sm:$0xff]  }
  0xf1   :  { %v165_v13 = vpop.f32.mrb[0].mxu1 }
  0xf2   :  { %v171_v14 = vadd.f32 %v165_v13, %v109_v9  ;;  %v662_v15 = vpop.f32.mrb[1].mxu1 }
  0xf3   :  { %v168_v16 = vpop.f32.mrb[2].mxu1 }
  0xf4   :  { %741 = vtanh.f32 %v171_v14  ;;  %v663_v17 = vpop.f32.mrb[3].mxu1 }
  0xfe   :  { %v742_v18 = vpop.eup %741 }
  0xff   :  { %v173_v19 = vpack.c.bf16 %v742_v18, %v742_v18 }
 0x101   :  { %669 = vmatmul.mubr.msk.bf16.vlgmr.msra.gmra.mrb[4].mxu0 %vm127_vm2, %v173_v19 }
 0x102   :  { %681 = vmatpush3.bf16.msra.mxu0 %v868_v2  ;;  %684 = vmatprep.mubr.msk.bf16.mxu0 %vm809_vm0, %v808_v0 }
 0x103   :  { %682 = vmatprep.subr.bf16.mxu0 %v808_v0 }
 0x106   :  { %683 = vmatpush3.bf16.msra.mxu0 %v877_v4 }
 0x107   :  { %696 = vmatprep.subr.bf16.mxu0 %v808_v0 }
 0x1d4   :  { %v211_v20 = vpop.f32.mrb[4].mxu0 }
 0x1d5   :  { %v218_v21 = vrot.slane %v211_v20, 6  ;;  %v670_v22 = vpop.f32.mrb[5].mxu0 }
 0x1d6   :  { %v214_v23 = vpop.f32.mrb[6].mxu0 }
 0x1d7   :  { %v220_v24 = vadd.f32 %v218_v21, %v109_v9  ;;  %v671_v25 = vpop.f32.mrb[7].mxu0 }
 0x1d9   :  { %743 = vtanh.f32 %v220_v24 }
 0x1e3   :  { %v744_v26 = vpop.eup %743 }
 0x1e4   :  { %v222_v27 = vpack.c.bf16 %v744_v26, %v744_v26 }
 0x1e6   :  { %v224_v28 = vrot.slane %v222_v27, 1 }
 0x1e8   :  { %677 = vmatmul.mubr.msk.bf16.vlgmr.msra.gmra.mrb[4].mxu1 %vm127_vm2, %v224_v28 }
 0x1e9   :  { %689 = vmatpush3.bf16.msra.mxu1 %v868_v2  ;;  %692 = vmatprep.mubr.msk.bf16.mxu1 %vm809_vm0, %v808_v0 }
 0x1ea   :  { %690 = vmatprep.subr.bf16.mxu1 %v808_v0 }
 0x1ed   :  { %691 = vmatpush3.bf16.msra.mxu1 %v877_v4 }
 0x1ee   :  { %704 = vmatprep.subr.bf16.mxu1 %v808_v0 }
 0x2bb   :  { %v262_v29 = vpop.f32.mrb[4].mxu1 }
 0x2bc   :  { %v269_v30 = vrot.slane %v262_v29, 4  ;;  %v678_v31 = vpop.f32.mrb[5].mxu1 }
 0x2bd   :  { %v265_v32 = vpop.f32.mrb[6].mxu1 }
 0x2be   :  { %v271_v33 = vadd.f32 %v269_v30, %v109_v9  ;;  %v679_v34 = vpop.f32.mrb[7].mxu1 }
 0x2c0   :  { %745 = vtanh.f32 %v271_v33 }
 0x2ca   :  { %v746_v35 = vpop.eup %745 }
 0x2cb   :  { %v273_v36 = vpack.c.bf16 %v746_v35, %v746_v35 }
 0x2cd   :  { %v275_v37 = vrot.slane %v273_v36, 2 }
 0x2cf   :  { %685 = vmatmul.mubr.msk.bf16.vlgmr.msra.gmra.mrb[8].mxu0 %vm127_vm2, %v275_v37 }
 0x2d0   :  { %697 = vmatpush3.bf16.msra.mxu0 %v868_v2  ;;  %700 = vmatprep.mubr.msk.bf16.mxu0 %vm809_vm0, %v808_v0 }
 0x2d1   :  { %698 = vmatprep.subr.bf16.mxu0 %v808_v0 }
 0x2d4   :  { %699 = vmatpush3.bf16.msra.mxu0 %v877_v4 }
 0x2d5   :  { %712 = vmatprep.subr.bf16.mxu0 %v808_v0 }
 0x3a2   :  { %v313_v38 = vpop.f32.mrb[8].mxu0 }
 0x3a3   :  { %v320_v39 = vrot.slane %v313_v38, 2  ;;  %v686_v40 = vpop.f32.mrb[9].mxu0 }
 0x3a4   :  { %v316_v41 = vpop.f32.mrb[10].mxu0 }
 0x3a5   :  { %v322_v42 = vadd.f32 %v320_v39, %v109_v9  ;;  %v687_v43 = vpop.f32.mrb[11].mxu0  ;;  %v739_v9 = vld [vmem:[%s969_s4] sm:$0xff]   ;;  %s595_s4 = sshll.u32 %s811_s21, 4  ;;  %s596_s4 = int_to_ptr.vmem [resolvable:$true] %s595_s4 }
 0x3a6   :  { %s779_s22 = scalar_lea.vmem %s596_s4, 32  ;;  %p784_p9 = scmp.lt.s32.totalorder %s596_s4, %s596_s4 }
 0x3a7   :  { %747 = vtanh.f32 %v322_v42  ;;  %p780_p8 = scmp.ne.s32.totalorder %s596_s4, %s779_s22  ;;  %p785_p10 = scmp.lt.s32.totalorder %s779_s22, %s779_s22 }
 0x3a9   :  { %p786_p11 = por %p785_p10, %p784_p9 }
 0x3ab   :  { %p787_p12 = pnand %p786_p11, %p780_p8 }
 0x3b1   :  { %v748_v44 = vpop.eup %747 }
 0x3b2   :  { %v324_v45 = vpack.c.bf16 %v748_v44, %v748_v44 }
 0x3b4   :  { %v326_v46 = vrot.slane %v324_v45, 3 }
 0x3b6   :  { %693 = vmatmul.mubr.msk.bf16.vlgmr.msra.gmra.mrb[8].mxu1 %vm127_vm2, %v326_v46 }
 0x3b7   :  { %705 = vmatpush3.bf16.msra.mxu1 %v868_v2  ;;  %708 = vmatprep.mubr.msk.bf16.mxu1 %vm809_vm0, %v808_v0 }
 0x3b8   :  { %706 = vmatprep.subr.bf16.mxu1 %v808_v0 }
 0x3bb   :  { %707 = vmatpush3.bf16.msra.mxu1 %v877_v4 }
 0x3bc   :  { %720 = vmatprep.subr.bf16.mxu1 %v808_v0 }
 0x489   :  { %v364_v47 = vpop.f32.mrb[8].mxu1 }
 0x48a   :  { %v370_v48 = vadd.f32 %v364_v47, %v898_v11  ;;  %v694_v49 = vpop.f32.mrb[9].mxu1 }
 0x48b   :  { %v367_v50 = vpop.f32.mrb[10].mxu1 }
 0x48c   :  { %749 = vtanh.f32 %v370_v48  ;;  %v695_v51 = vpop.f32.mrb[11].mxu1 }
 0x496   :  { %v750_v52 = vpop.eup %749 }
 0x497   :  { %v372_v53 = vpack.c.bf16 %v750_v52, %v750_v52 }
 0x499   :  { %701 = vmatmul.mubr.msk.bf16.vlgmr.msra.gmra.mrb[12].mxu0 %vm127_vm2, %v372_v53 }
 0x49a   :  { %713 = vmatpush3.bf16.msra.mxu0 %v868_v2  ;;  %716 = vmatprep.mubr.msk.bf16.mxu0 %vm809_vm0, %v808_v0 }
 0x49b   :  { %714 = vmatprep.subr.bf16.mxu0 %v808_v0 }
 0x49e   :  { %715 = vmatpush3.bf16.msra.mxu0 %v877_v4 }
 0x56c   :  { %v410_v54 = vpop.f32.mrb[12].mxu0 }
 0x56d   :  { %v417_v55 = vrot.slane %v410_v54, 6  ;;  %v702_v56 = vpop.f32.mrb[13].mxu0 }
 0x56e   :  { %v413_v57 = vpop.f32.mrb[14].mxu0 }
 0x56f   :  { %v419_v58 = vadd.f32 %v417_v55, %v898_v11  ;;  %v703_v59 = vpop.f32.mrb[15].mxu0 }
 0x571   :  { %751 = vtanh.f32 %v419_v58 }
 0x57b   :  { %v752_v60 = vpop.eup %751 }
 0x57c   :  { %v421_v61 = vpack.c.bf16 %v752_v60, %v752_v60 }
 0x57e   :  { %v423_v62 = vrot.slane %v421_v61, 1 }
 0x580   :  { %709 = vmatmul.mubr.msk.bf16.vlgmr.msra.gmra.mrb[12].mxu1 %vm127_vm2, %v423_v62 }
 0x581   :  { %724 = vmatprep.mubr.msk.bf16.mxu1 %vm809_vm0, %v808_v0  ;;  %721 = vmatpush3.bf16.msra.mxu1 %v739_v9 }
 0x582   :  { %722 = vmatprep.subr.bf16.mxu1 %v808_v0  ;;  %v617_v0 = vld [vmem:[%s970_s5] ss:$0 sm:$0xff] }
 0x585   :  { %723 = vmatpush3.bf16.msra.mxu1 %v740_v10 }
 0x653   :  { %v461_v63 = vpop.f32.mrb[12].mxu1 }
 0x654   :  { %v468_v1 = vrot.slane %v461_v63, 4  ;;  %v710_v2 = vpop.f32.mrb[13].mxu1 }
 0x655   :  { %v464_v3 = vpop.f32.mrb[14].mxu1 }
 0x656   :  { %v470_v4 = vadd.f32 %v468_v1, %v898_v11  ;;  %v711_v5 = vpop.f32.mrb[15].mxu1 }
 0x658   :  { %753 = vtanh.f32 %v470_v4 }
 0x662   :  { %v754_v6 = vpop.eup %753 }
 0x663   :  { %v472_v7 = vpack.c.bf16 %v754_v6, %v754_v6 }
 0x665   :  { %v474_v8 = vrot.slane %v472_v7, 2 }
 0x667   :  { %717 = vmatmul.mubr.msk.bf16.vlgmr.msra.gmra.mrb[16].mxu0 %vm127_vm2, %v474_v8 }
 0x73a   :  { %v512_v12 = vpop.f32.mrb[16].mxu0 }
 0x73b   :  { %v519_v13 = vrot.slane %v512_v12, 2  ;;  %v718_v14 = vpop.f32.mrb[17].mxu0 }
 0x73c   :  { %v515_v15 = vpop.f32.mrb[18].mxu0 }
 0x73d   :  { %v521_v16 = vadd.f32 %v519_v13, %v898_v11  ;;  %v719_v17 = vpop.f32.mrb[19].mxu0 }
 0x73f   :  { %755 = vtanh.f32 %v521_v16 }
 0x749   :  { %v756_v18 = vpop.eup %755 }
 0x74a   :  { %v523_v19 = vpack.c.bf16 %v756_v18, %v756_v18 }
 0x74c   :  { %v531_v20 = vrot.slane %v523_v19, 3 }
 0x74e   :  { %725 = vmatmul.mubr.msk.bf16.vlgmr.msra.gmra.mrb[16].mxu1 %vm127_vm2, %v531_v20 }
 0x821   :  { %v581_v21 = vpop.f32.mrb[16].mxu1 }
 0x822   :  { %v582_v22 = vadd.f32 %v617_v0, %v581_v21  ;;  %v726_v23 = vpop.f32.mrb[17].mxu1 }
 0x823   :  { %v584_v24 = vpop.f32.mrb[18].mxu1 }
 0x824   :  { %v727_v11 = vpop.f32.mrb[19].mxu1  ;;  %588 = vst.msk [vmem:[#allocation5] sm:$0x3] %vm587_vm3, %v582_v22 }
 0x825   :  { %790 = shalt.err (!%p787_p12)
}
 0x826   :  { %s791_s5 = scalar_lea.hbm %s971_s6, 32 }
 0x827   :  { %p792_p13 = scmp.ne.s32.totalorder %s971_s6, %s791_s5  ;;  %p795_p0 = scmp.lt.u32.totalorder %s791_s5, %s971_s6 }
 0x829   :  { %p797_p1 = pnand %p795_p0, %p792_p13 }
 0x82b   :  { %800 = shalt.err (!%p797_p1)
}
 0x82c   :  { %598 = dma.vmem_to_hbm [thread:$0]  %s596_s4, 32, %s971_s6, [#allocation4]  }
 0x82d   :  { %803 = dma.done.wait [#allocation4], 32  }
 0x82e   :  { %804 = vsyncadd [#allocation4], 4294967264 }
 0x82f   :  { %602 = vsyncpa [#allocation3], 1 }
 0x830   :  { %603 = vsyncpa [#allocation4], 1 }

</bundles_post_ra>
